<compile_context>
chip_gen: v7x
topology: tpu7x:2x2x1
jax: 0.10.0
libtpu: 0.0.40
codegen_flags: <defaults>
</compile_context>

<pallas_src>
import functools

import numpy as np
import jax
import jax.numpy as jnp
from jax import lax
from jax.experimental import pallas as pl
from jax.experimental.pallas import tpu as pltpu


# ----------------------------- kernel ---------------------------------------

def _apply_mlp(x, param_refs, n_layers, relu_after_last):
    """Sequential Linear(+ReLU) stack; bf16 matmuls, f32 accumulation."""
    for i in range(n_layers):
        w = param_refs[2 * i][...]        # (in, out)  bf16
        b = param_refs[2 * i + 1][...]    # (1, out)   f32
        x = jnp.dot(x.astype(jnp.bfloat16), w,
                    preferred_element_type=jnp.float32) + b
        if relu_after_last or i < n_layers - 1:
            x = jnp.maximum(x, 0.0)
    return x


def nn_model_kernel(n_body, n_head, n_critic, action_size, *refs):
    # refs: states, gumbel, body params, head params, (critic params), out
    states_ref, gumbel_ref = refs[0], refs[1]
    p = 2
    body_refs = refs[p:p + 2 * n_body];     p += 2 * n_body
    head_refs = refs[p:p + 2 * n_head];     p += 2 * n_head
    critic_refs = refs[p:p + 2 * n_critic]; p += 2 * n_critic
    out_ref = refs[p]

    x = states_ref[...]                                    # (TB, S) f32

    # body: Linear + ReLU for every hidden layer
    h = _apply_mlp(x, body_refs, n_body, relu_after_last=True)

    # heads: fused (logits | v) in one MLP, or separate fallback
    head = _apply_mlp(h, head_refs, n_head, relu_after_last=False)
    if n_critic == 0:
        logits = head[:, :action_size]                     # (TB, A) f32
        v = head[:, action_size:action_size + 1]           # (TB, 1) f32
    else:
        logits = head
        v = _apply_mlp(h, critic_refs, n_critic, relu_after_last=False)

    # stable log-softmax (single exp pass)
    m = jnp.max(logits, axis=-1, keepdims=True)
    shifted = logits - m
    e = jnp.exp(shifted)
    s = jnp.sum(e, axis=-1, keepdims=True)
    log_sm = shifted - jnp.log(s)
    probs = e * pl.reciprocal(s, approx=True)

    # categorical entropy: -sum(p * log p)
    ent = -jnp.sum(probs * log_sm, axis=-1, keepdims=True)

    # categorical sample via Gumbel-max (noise supplied by the host PRNG).
    # Tie-break: lowest index among maxima == jnp.argmax first-max semantics.
    z = logits + gumbel_ref[...]
    iota = lax.broadcasted_iota(jnp.int32, logits.shape, 1)
    is_max = z >= jnp.max(z, axis=-1, keepdims=True)
    action = jnp.min(jnp.where(is_max, iota, action_size), axis=-1,
                     keepdims=True)

    # log_prob(action): gather log-softmax at the sampled action via a mask
    log_pi_a = jnp.sum(jnp.where(iota == action, log_sm, 0.0),
                       axis=-1, keepdims=True)

    # packed output columns: [action, log_pi_a, ent, v]
    out_ref[:, 0:1] = action.astype(jnp.float32)
    out_ref[:, 1:2] = log_pi_a
    out_ref[:, 2:3] = ent
    out_ref[:, 3:4] = v


# ----------------------------- head fusion -----------------------------------

def _fuse_heads(actor_params, critic_params):
    """Fuse actor/critic MLPs into one (concat first layer, block-diag rest).

    Valid whenever both heads have the same number of Linear layers (their
    ReLU positions then coincide). Returns None when depths differ.
    """
    na, nc = len(actor_params) // 2, len(critic_params) // 2
    if na != nc:
        return None
    fused = []
    for i in range(na):
        wa, ba = actor_params[2 * i], actor_params[2 * i + 1]
        wc, bc = critic_params[2 * i], critic_params[2 * i + 1]
        if i == 0:
            w = jnp.concatenate([wa, wc], axis=1)
        else:
            top = jnp.concatenate(
                [wa, jnp.zeros((wa.shape[0], wc.shape[1]), wa.dtype)], axis=1)
            bot = jnp.concatenate(
                [jnp.zeros((wc.shape[0], wa.shape[1]), wc.dtype), wc], axis=1)
            w = jnp.concatenate([top, bot], axis=0)
        b = jnp.concatenate([ba, bc], axis=1)
        fused += [w, b]
    return fused


# ----------------------------- wrapper ---------------------------------------

def nn_model_forward(states, gumbel, body_params, actor_params, critic_params,
                     action_size, batch_tile=1024):
    """Fused PPO forward (sampling path) as a batch-gridded Pallas kernel."""
    # TODO(synk): support the `actions is not None` evaluation path of the
    # torch module (log_prob/entropy of externally supplied actions).
    B, S = states.shape
    A = gumbel.shape[1]
    TB = min(batch_tile, B)
    grid = (pl.cdiv(B, TB),)

    fused = _fuse_heads(actor_params, critic_params)
    if fused is not None:
        head_params, crit_params = fused, []
    else:  # depth mismatch: run the two heads separately inside the kernel
        head_params, crit_params = list(actor_params), list(critic_params)

    def prep(params):   # weights -> bf16 for the MXU, biases stay f32
        out = []
        for i in range(0, len(params), 2):
            out.append(params[i].astype(jnp.bfloat16))
            out.append(params[i + 1].astype(jnp.float32))
        return out

    body_p, head_p, crit_p = prep(body_params), prep(head_params), prep(crit_params)
    n_body, n_head, n_crit = len(body_p) // 2, len(head_p) // 2, len(crit_p) // 2

    params_flat = body_p + head_p + crit_p
    inputs = [states, gumbel] + params_flat

    in_specs = [
        pl.BlockSpec((TB, S), lambda i: (i, 0)),   # states: batch-tiled
        pl.BlockSpec((TB, A), lambda i: (i, 0)),   # gumbel: batch-tiled
    ]
    # weights/biases: full block + constant index_map -> resident in VMEM
    in_specs += [pl.BlockSpec(p.shape, lambda i: (0, 0)) for p in params_flat]

    out_spec = pl.BlockSpec((TB, 4), lambda i: (i, 0))
    out_shape = jax.ShapeDtypeStruct((B, 4), jnp.float32)

    kernel = functools.partial(nn_model_kernel, n_body, n_head, n_crit,
                               action_size)

    packed = pl.pallas_call(
        kernel,
        out_shape=out_shape,
        grid=grid,
        in_specs=in_specs,
        out_specs=out_spec,
        compiler_params=pltpu.CompilerParams(
            dimension_semantics=("parallel",)),   # megacore-shard batch on v7x
    )(*inputs)

    # TODO(synk): torch Categorical.sample() returns int64; int32 returned here.
    return {
        "a": packed[:, 0].astype(jnp.int32),   # (B,)  like torch .sample()
        "log_pi_a": packed[:, 1:2],            # (B, 1)
        "ent": packed[:, 2:3],                 # (B, 1)
        "v": packed[:, 3:4],                   # (B, 1)
    }


# ----------------------------- param init ------------------------------------

def make_mlp_params(key, sizes):
    """Deterministic Linear params: weights (in,out), biases (1,out)."""
    params = []
    for in_dim, out_dim in zip(sizes[:-1], sizes[1:]):
        key, kw, kb = jax.random.split(key, 3)
        w = jax.random.normal(kw, (in_dim, out_dim), jnp.float32) \
            * (1.0 / np.sqrt(in_dim))
        b = jax.random.normal(kb, (1, out_dim), jnp.float32) * 0.01
        params += [w, b]
    return key, params


# ----------------------------- reference (plain JAX) --------------------------

def _mlp_ref(x, params, relu_after_last):
    n = len(params) // 2
    for i in range(n):
        w = params[2 * i].astype(jnp.bfloat16)
        b = params[2 * i + 1]
        x = jnp.dot(x.astype(jnp.bfloat16), w,
                    preferred_element_type=jnp.float32) + b
        if relu_after_last or i < n - 1:
            x = jnp.maximum(x, 0.0)
    return x


def reference_forward(states, gumbel, body_p, actor_p, critic_p, action_size):
    h = _mlp_ref(states, body_p, True)
    v = _mlp_ref(h, critic_p, False)
    logits = _mlp_ref(h, actor_p, False)
    log_sm = jax.nn.log_softmax(logits, axis=-1)
    probs = jnp.exp(log_sm)
    ent = -jnp.sum(probs * log_sm, axis=-1, keepdims=True)
    a = jnp.argmax(logits + gumbel, axis=-1)
    log_pi_a = jnp.take_along_axis(log_sm, a[:, None], axis=-1)
    return {"a": a.astype(jnp.int32), "log_pi_a": log_pi_a, "ent": ent, "v": v}


def _check(out, ref):
    np.testing.assert_array_equal(np.asarray(out["a"]), np.asarray(ref["a"]))
    np.testing.assert_allclose(np.asarray(out["log_pi_a"]),
                               np.asarray(ref["log_pi_a"]),
                               rtol=2e-3, atol=2e-3)
    np.testing.assert_allclose(np.asarray(out["ent"]),
                               np.asarray(ref["ent"]), rtol=1e-2, atol=1e-2)
    np.testing.assert_allclose(np.asarray(out["v"]),
                               np.asarray(ref["v"]), rtol=2e-3, atol=2e-3)


# ----------------------------- main -------------------------------------------

if __name__ == "__main__":
    state_size = 32
    body_hidden_sizes = [64, 32]
    actor_hidden_sizes = [32]
    critic_hidden_sizes = [32]
    action_size = 4

    key = jax.random.PRNGKey(0)
    key, body_params = make_mlp_params(key, [state_size] + body_hidden_sizes)
    key, actor_params = make_mlp_params(
        key, [body_hidden_sizes[-1]] + actor_hidden_sizes + [action_size])
    key, critic_params = make_mlp_params(
        key, [body_hidden_sizes[-1]] + critic_hidden_sizes + [1])

    # -- test 1: small batch, single grid step ---------------------------------
    B = 8
    key, k_s, k_g = jax.random.split(key, 3)
    states = jax.random.normal(k_s, (B, state_size), jnp.float32)
    gumbel = jax.random.gumbel(k_g, (B, action_size), jnp.float32)

    out = nn_model_forward(states, gumbel, body_params, actor_params,
                           critic_params, action_size)
    jax.block_until_ready(out)
    ref = reference_forward(states, gumbel, body_params, actor_params,
                            critic_params, action_size)
    _check(out, ref)

    # -- test 2: larger batch, multi-step pipelined grid (weights resident) ----
    B2, TB2 = 256, 64
    key, k_s2, k_g2 = jax.random.split(key, 3)
    states2 = jax.random.normal(k_s2, (B2, state_size), jnp.float32)
    gumbel2 = jax.random.gumbel(k_g2, (B2, action_size), jnp.float32)

    out2 = nn_model_forward(states2, gumbel2, body_params, actor_params,
                            critic_params, action_size, batch_tile=TB2)
    jax.block_until_ready(out2)
    ref2 = reference_forward(states2, gumbel2, body_params, actor_params,
                             critic_params, action_size)
    _check(out2, ref2)

    print("KERNEL_OK")
</pallas_src>

<mosaic_0001>
module attributes {stable_mosaic.version = 11 : i64} {
  func.func @nn_model_kernel(%arg0: i32, %arg1: memref<8x32xf32, #tpu.memory_space<vmem>>, %arg2: memref<8x4xf32, #tpu.memory_space<vmem>>, %arg3: memref<32x64xbf16, #tpu.memory_space<vmem>>, %arg4: memref<1x64xf32, #tpu.memory_space<vmem>>, %arg5: memref<64x32xbf16, #tpu.memory_space<vmem>>, %arg6: memref<1x32xf32, #tpu.memory_space<vmem>>, %arg7: memref<32x64xbf16, #tpu.memory_space<vmem>>, %arg8: memref<1x64xf32, #tpu.memory_space<vmem>>, %arg9: memref<64x5xbf16, #tpu.memory_space<vmem>>, %arg10: memref<1x5xf32, #tpu.memory_space<vmem>>, %arg11: memref<8x4xf32, #tpu.memory_space<vmem>>) attributes {dimension_semantics = [#tpu.dimension_semantics<parallel>], iteration_bounds = array<i64: 1>, scalar_prefetch = 0 : i64, scratch_operands = 0 : i64, tpu.core_type = #tpu.core_type<tc>, window_params = [{transform_indices = @transform_0, window_bounds = array<i64: 8, 32>}, {transform_indices = @transform_1, window_bounds = array<i64: 8, 4>}, {pipeline_mode = #tpu.pipeline_mode<synchronous>, transform_indices = @transform_2, window_bounds = array<i64: 32, 64>}, {pipeline_mode = #tpu.pipeline_mode<synchronous>, transform_indices = @transform_3, window_bounds = array<i64: 1, 64>}, {pipeline_mode = #tpu.pipeline_mode<synchronous>, transform_indices = @transform_4, window_bounds = array<i64: 64, 32>}, {pipeline_mode = #tpu.pipeline_mode<synchronous>, transform_indices = @transform_5, window_bounds = array<i64: 1, 32>}, {pipeline_mode = #tpu.pipeline_mode<synchronous>, transform_indices = @transform_6, window_bounds = array<i64: 32, 64>}, {pipeline_mode = #tpu.pipeline_mode<synchronous>, transform_indices = @transform_7, window_bounds = array<i64: 1, 64>}, {pipeline_mode = #tpu.pipeline_mode<synchronous>, transform_indices = @transform_8, window_bounds = array<i64: 64, 5>}, {pipeline_mode = #tpu.pipeline_mode<synchronous>, transform_indices = @transform_9, window_bounds = array<i64: 1, 5>}, {transform_indices = @transform_10, window_bounds = array<i64: 8, 4>}]} {
    %c0 = arith.constant 0 : index
    %c0_0 = arith.constant 0 : index
    %0 = vector.load %arg1[%c0, %c0_0] : memref<8x32xf32, #tpu.memory_space<vmem>>, vector<8x32xf32>
    %c0_1 = arith.constant 0 : index
    %c0_2 = arith.constant 0 : index
    %1 = vector.load %arg3[%c0_1, %c0_2] : memref<32x64xbf16, #tpu.memory_space<vmem>>, vector<32x64xbf16>
    %c0_3 = arith.constant 0 : index
    %c0_4 = arith.constant 0 : index
    %2 = vector.load %arg4[%c0_3, %c0_4] : memref<1x64xf32, #tpu.memory_space<vmem>>, vector<1x64xf32>
    %3 = arith.truncf %0 : vector<8x32xf32> to vector<8x32xbf16>
    %cst = arith.constant dense<0.000000e+00> : vector<8x64xf32>
    %4 = tpu.matmul %3, %1, %cst {dimension_numbers = #tpu.dot_dimension_numbers<[1], [0], [0], [1], [0, 0, 1, 1], [], []>} : vector<8x32xbf16>, vector<32x64xbf16>, vector<8x64xf32> -> vector<8x64xf32>
    %5 = vector.broadcast %2 : vector<1x64xf32> to vector<8x64xf32>
    %6 = arith.addf %4, %5 : vector<8x64xf32>
    %cst_5 = arith.constant 0.000000e+00 : f32
    %7 = vector.broadcast %cst_5 : f32 to vector<8x64xf32>
    %8 = arith.maximumf %6, %7 : vector<8x64xf32>
    %c0_6 = arith.constant 0 : index
    %c0_7 = arith.constant 0 : index
    %9 = vector.load %arg5[%c0_6, %c0_7] : memref<64x32xbf16, #tpu.memory_space<vmem>>, vector<64x32xbf16>
    %c0_8 = arith.constant 0 : index
    %c0_9 = arith.constant 0 : index
    %10 = vector.load %arg6[%c0_8, %c0_9] : memref<1x32xf32, #tpu.memory_space<vmem>>, vector<1x32xf32>
    %11 = arith.truncf %8 : vector<8x64xf32> to vector<8x64xbf16>
    %cst_10 = arith.constant dense<0.000000e+00> : vector<8x32xf32>
    %12 = tpu.matmul %11, %9, %cst_10 {dimension_numbers = #tpu.dot_dimension_numbers<[1], [0], [0], [1], [0, 0, 1, 1], [], []>} : vector<8x64xbf16>, vector<64x32xbf16>, vector<8x32xf32> -> vector<8x32xf32>
    %13 = vector.broadcast %10 : vector<1x32xf32> to vector<8x32xf32>
    %14 = arith.addf %12, %13 : vector<8x32xf32>
    %cst_11 = arith.constant 0.000000e+00 : f32
    %15 = vector.broadcast %cst_11 : f32 to vector<8x32xf32>
    %16 = arith.maximumf %14, %15 : vector<8x32xf32>
    %c0_12 = arith.constant 0 : index
    %c0_13 = arith.constant 0 : index
    %17 = vector.load %arg7[%c0_12, %c0_13] : memref<32x64xbf16, #tpu.memory_space<vmem>>, vector<32x64xbf16>
    %c0_14 = arith.constant 0 : index
    %c0_15 = arith.constant 0 : index
    %18 = vector.load %arg8[%c0_14, %c0_15] : memref<1x64xf32, #tpu.memory_space<vmem>>, vector<1x64xf32>
    %19 = arith.truncf %16 : vector<8x32xf32> to vector<8x32xbf16>
    %cst_16 = arith.constant dense<0.000000e+00> : vector<8x64xf32>
    %20 = tpu.matmul %19, %17, %cst_16 {dimension_numbers = #tpu.dot_dimension_numbers<[1], [0], [0], [1], [0, 0, 1, 1], [], []>} : vector<8x32xbf16>, vector<32x64xbf16>, vector<8x64xf32> -> vector<8x64xf32>
    %21 = vector.broadcast %18 : vector<1x64xf32> to vector<8x64xf32>
    %22 = arith.addf %20, %21 : vector<8x64xf32>
    %cst_17 = arith.constant 0.000000e+00 : f32
    %23 = vector.broadcast %cst_17 : f32 to vector<8x64xf32>
    %24 = arith.maximumf %22, %23 : vector<8x64xf32>
    %c0_18 = arith.constant 0 : index
    %c0_19 = arith.constant 0 : index
    %25 = vector.load %arg9[%c0_18, %c0_19] : memref<64x5xbf16, #tpu.memory_space<vmem>>, vector<64x5xbf16>
    %c0_20 = arith.constant 0 : index
    %c0_21 = arith.constant 0 : index
    %26 = vector.load %arg10[%c0_20, %c0_21] : memref<1x5xf32, #tpu.memory_space<vmem>>, vector<1x5xf32>
    %27 = arith.truncf %24 : vector<8x64xf32> to vector<8x64xbf16>
    %cst_22 = arith.constant dense<0.000000e+00> : vector<8x5xf32>
    %28 = tpu.matmul %27, %25, %cst_22 {dimension_numbers = #tpu.dot_dimension_numbers<[1], [0], [0], [1], [0, 0, 1, 1], [], []>} : vector<8x64xbf16>, vector<64x5xbf16>, vector<8x5xf32> -> vector<8x5xf32>
    %29 = vector.broadcast %26 : vector<1x5xf32> to vector<8x5xf32>
    %30 = arith.addf %28, %29 : vector<8x5xf32>
    %31 = vector.extract_strided_slice %30 {offsets = [0, 0], sizes = [8, 4], strides = [1, 1]} : vector<8x5xf32> to vector<8x4xf32>
    %32 = vector.extract_strided_slice %30 {offsets = [0, 4], sizes = [8, 1], strides = [1, 1]} : vector<8x5xf32> to vector<8x1xf32>
    %cst_23 = arith.constant dense<0xFF800000> : vector<8xf32>
    %33 = vector.multi_reduction <maximumf>, %31, %cst_23 [1] : vector<8x4xf32> to vector<8xf32>
    %34 = vector.shape_cast %33 : vector<8xf32> to vector<8x1xf32>
    %35 = vector.broadcast %34 : vector<8x1xf32> to vector<8x4xf32>
    %36 = arith.subf %31, %35 : vector<8x4xf32>
    %37 = math.exp %36 : vector<8x4xf32>
    %cst_24 = arith.constant dense<0.000000e+00> : vector<8xf32>
    %38 = vector.multi_reduction <add>, %37, %cst_24 [1] : vector<8x4xf32> to vector<8xf32>
    %39 = vector.shape_cast %38 : vector<8xf32> to vector<8x1xf32>
    %40 = math.log %39 : vector<8x1xf32>
    %41 = vector.broadcast %40 : vector<8x1xf32> to vector<8x4xf32>
    %42 = arith.subf %36, %41 : vector<8x4xf32>
    %43 = tpu.reciprocal %39 {approx = true} : vector<8x1xf32> -> vector<8x1xf32>
    %44 = vector.broadcast %43 : vector<8x1xf32> to vector<8x4xf32>
    %45 = arith.mulf %37, %44 : vector<8x4xf32>
    %46 = arith.mulf %45, %42 : vector<8x4xf32>
    %cst_25 = arith.constant dense<0.000000e+00> : vector<8xf32>
    %47 = vector.multi_reduction <add>, %46, %cst_25 [1] : vector<8x4xf32> to vector<8xf32>
    %48 = vector.shape_cast %47 : vector<8xf32> to vector<8x1xf32>
    %cst_26 = arith.constant 0.000000e+00 : f32
    %49 = vector.broadcast %cst_26 : f32 to vector<8x1xf32>
    %50 = arith.subf %49, %48 : vector<8x1xf32>
    %c0_27 = arith.constant 0 : index
    %c0_28 = arith.constant 0 : index
    %51 = vector.load %arg2[%c0_27, %c0_28] : memref<8x4xf32, #tpu.memory_space<vmem>>, vector<8x4xf32>
    %52 = arith.addf %31, %51 : vector<8x4xf32>
    %53 = tpu.iota {dimensions = array<i32: 1>} : vector<8x4xi32>
    %cst_29 = arith.constant dense<0xFF800000> : vector<8xf32>
    %54 = vector.multi_reduction <maximumf>, %52, %cst_29 [1] : vector<8x4xf32> to vector<8xf32>
    %55 = vector.shape_cast %54 : vector<8xf32> to vector<8x1xf32>
    %56 = vector.broadcast %55 : vector<8x1xf32> to vector<8x4xf32>
    %57 = arith.cmpf oge, %52, %56 : vector<8x4xf32>
    %c4_i32 = arith.constant 4 : i32
    %58 = vector.broadcast %c4_i32 : i32 to vector<8x4xi32>
    %59 = arith.select %57, %53, %58 : vector<8x4xi1>, vector<8x4xi32>
    %cst_30 = arith.constant dense<2147483647> : vector<8xi32>
    %60 = vector.multi_reduction <minsi>, %59, %cst_30 [1] : vector<8x4xi32> to vector<8xi32>
    %61 = vector.shape_cast %60 : vector<8xi32> to vector<8x1xi32>
    %62 = vector.broadcast %61 : vector<8x1xi32> to vector<8x4xi32>
    %63 = arith.cmpi eq, %53, %62 : vector<8x4xi32>
    %cst_31 = arith.constant 0.000000e+00 : f32
    %64 = vector.broadcast %cst_31 : f32 to vector<8x4xf32>
    %65 = arith.select %63, %42, %64 : vector<8x4xi1>, vector<8x4xf32>
    %cst_32 = arith.constant dense<0.000000e+00> : vector<8xf32>
    %66 = vector.multi_reduction <add>, %65, %cst_32 [1] : vector<8x4xf32> to vector<8xf32>
    %67 = vector.shape_cast %66 : vector<8xf32> to vector<8x1xf32>
    %68 = arith.sitofp %61 : vector<8x1xi32> to vector<8x1xf32>
    %c0_33 = arith.constant 0 : index
    %c0_34 = arith.constant 0 : index
    %69 = vector.load %arg11[%c0_33, %c0_34] : memref<8x4xf32, #tpu.memory_space<vmem>>, vector<8x1xf32>
    tpu.vector_store %arg11[%c0_33, %c0_34], %68 {strides = array<i32>} : memref<8x4xf32, #tpu.memory_space<vmem>>, vector<8x1xf32>,
    %c0_35 = arith.constant 0 : index
    %c1 = arith.constant 1 : index
    %70 = vector.load %arg11[%c0_35, %c1] : memref<8x4xf32, #tpu.memory_space<vmem>>, vector<8x1xf32>
    tpu.vector_store %arg11[%c0_35, %c1], %67 {strides = array<i32>} : memref<8x4xf32, #tpu.memory_space<vmem>>, vector<8x1xf32>,
    %c0_36 = arith.constant 0 : index
    %c2 = arith.constant 2 : index
    %71 = vector.load %arg11[%c0_36, %c2] : memref<8x4xf32, #tpu.memory_space<vmem>>, vector<8x1xf32>
    tpu.vector_store %arg11[%c0_36, %c2], %50 {strides = array<i32>} : memref<8x4xf32, #tpu.memory_space<vmem>>, vector<8x1xf32>,
    %c0_37 = arith.constant 0 : index
    %c3 = arith.constant 3 : index
    %72 = vector.load %arg11[%c0_37, %c3] : memref<8x4xf32, #tpu.memory_space<vmem>>, vector<8x1xf32>
    tpu.vector_store %arg11[%c0_37, %c3], %32 {strides = array<i32>} : memref<8x4xf32, #tpu.memory_space<vmem>>, vector<8x1xf32>,
    return
  }
  func.func @transform_0(%arg0: i32) -> (i32, i32) {
    %c0_i32 = arith.constant 0 : i32
    %c0_i32_0 = arith.constant 0 : i32
    return %arg0, %c0_i32 : i32, i32
  }
  func.func @transform_1(%arg0: i32) -> (i32, i32) {
    %c0_i32 = arith.constant 0 : i32
    %c0_i32_0 = arith.constant 0 : i32
    return %arg0, %c0_i32 : i32, i32
  }
  func.func @transform_2(%arg0: i32) -> (i32, i32) {
    %c0_i32 = arith.constant 0 : i32
    %c0_i32_0 = arith.constant 0 : i32
    %c0_i32_1 = arith.constant 0 : i32
    return %c0_i32, %c0_i32_0 : i32, i32
  }
  func.func @transform_3(%arg0: i32) -> (i32, i32) {
    %c0_i32 = arith.constant 0 : i32
    %c0_i32_0 = arith.constant 0 : i32
    %c0_i32_1 = arith.constant 0 : i32
    return %c0_i32, %c0_i32_0 : i32, i32
  }
  func.func @transform_4(%arg0: i32) -> (i32, i32) {
    %c0_i32 = arith.constant 0 : i32
    %c0_i32_0 = arith.constant 0 : i32
    %c0_i32_1 = arith.constant 0 : i32
    return %c0_i32, %c0_i32_0 : i32, i32
  }
  func.func @transform_5(%arg0: i32) -> (i32, i32) {
    %c0_i32 = arith.constant 0 : i32
    %c0_i32_0 = arith.constant 0 : i32
    %c0_i32_1 = arith.constant 0 : i32
    return %c0_i32, %c0_i32_0 : i32, i32
  }
  func.func @transform_6(%arg0: i32) -> (i32, i32) {
    %c0_i32 = arith.constant 0 : i32
    %c0_i32_0 = arith.constant 0 : i32
    %c0_i32_1 = arith.constant 0 : i32
    return %c0_i32, %c0_i32_0 : i32, i32
  }
  func.func @transform_7(%arg0: i32) -> (i32, i32) {
    %c0_i32 = arith.constant 0 : i32
    %c0_i32_0 = arith.constant 0 : i32
    %c0_i32_1 = arith.constant 0 : i32
    return %c0_i32, %c0_i32_0 : i32, i32
  }
  func.func @transform_8(%arg0: i32) -> (i32, i32) {
    %c0_i32 = arith.constant 0 : i32
    %c0_i32_0 = arith.constant 0 : i32
    %c0_i32_1 = arith.constant 0 : i32
    return %c0_i32, %c0_i32_0 : i32, i32
  }
  func.func @transform_9(%arg0: i32) -> (i32, i32) {
    %c0_i32 = arith.constant 0 : i32
    %c0_i32_0 = arith.constant 0 : i32
    %c0_i32_1 = arith.constant 0 : i32
    return %c0_i32, %c0_i32_0 : i32, i32
  }
  func.func @transform_10(%arg0: i32) -> (i32, i32) {
    %c0_i32 = arith.constant 0 : i32
    %c0_i32_0 = arith.constant 0 : i32
    return %arg0, %c0_i32 : i32, i32
  }
}

</mosaic_0001>

<bundles_post_ra>
// kernel: tpu_custom_call.1
= control target key start
LH: loop header
LB: loop body
LE: loop exit
PB: predicated region body
PF: predicated region fallthrough
CT: control target
= control target key end

     0   :  { %v505_v0 = vmov 0.0   ;;  %vm506_vm0 = vmmov 0   ;;  %vm61_vm1 = vcmask 261120   ;;  %vm146_vm2 = vcmask 523264   ;;  %s659_s2 = inlined_call_operand.vmem [shape: bf16[32,64], index: 2, kind: input, shape index: {}]   ;;  %s660_s0 = inlined_call_operand.vmem [shape: f32[8,32], index: 0, kind: input, shape index: {}]   ;;  %s661_s4 = inlined_call_operand.vmem [shape: bf16[64,32], index: 4, kind: input, shape index: {}]   ;;  %s662_s3 = inlined_call_operand.vmem [shape: f32[1,64], index: 3, kind: input, shape index: {}]   ;;  %s663_s6 = inlined_call_operand.vmem [shape: bf16[32,64], index: 6, kind: input, shape index: {}]   ;;  %s664_s8 = inlined_call_operand.vmem [shape: bf16[64,5], index: 8, kind: input, shape index: {}]   ;;  %s665_s5 = inlined_call_operand.vmem [shape: f32[1,32], index: 5, kind: input, shape index: {}]   ;;  %s666_s7 = inlined_call_operand.vmem [shape: f32[1,64], index: 7, kind: input, shape index: {}]   ;;  %s667_s9 = inlined_call_operand.vmem [shape: f32[1,5], index: 9, kind: input, shape index: {}]   ;;  %s668_s1 = inlined_call_operand.vmem [shape: f32[8,4], index: 1, kind: input, shape index: {}]   ;;  %s669_s10 = inlined_call_operand.vmem [shape: f32[8,4], index: 10, kind: output, shape index: {}]  }
   0x1   :  { %444 = vmatprep.subr.bf16.mxu1 %v505_v0  ;;  %v487_v1 = vld [vmem:[%s659_s2] sm:$0xff]   ;;  %448 = vmatprep.mubr.msk.bf16.mxu1 %vm506_vm0, %v505_v0  ;;  %v488_v2 = vld [vmem:[%s659_s2 + $0x8] sm:$0xff]   ;;  %v491_v7 = vld [vmem:[%s661_s4 + $0x10] sm:$0xff]   ;;  %vm342_vm3 = vcmask 31744   ;;  %v364_v49 = vlaneseq  ;;  %vm392_vm6 = vcmask 7168   ;;  %vm394_vm8 = vcmask 15368  }
   0x2   :  { %464 = vmatprep.subr.bf16.mxu0 %v505_v0  ;;  %468 = vmatprep.mubr.msk.bf16.mxu0 %vm506_vm0, %v505_v0  ;;  %v36_v3 = vld [vmem:[%s660_s0] sm:$0xff]  ;;  %v490_v6 = vld [vmem:[%s661_s4 + $0x8] sm:$0xff]   ;;  %v492_v8 = vld [vmem:[%s661_s4 + $0x18] sm:$0xff]   ;;  %vm396_vm9 = vcmask 23568   ;;  %vm402_vm10 = vcmask 31768  }
   0x3   :  { %445 = vmatpush3.bf16.msra.mxu1 %v487_v1  ;;  %v42_v4 = vpack.c.bf16 %v36_v3, %v36_v3  ;;  %v489_v5 = vld [vmem:[%s661_s4] sm:$0xff]   ;;  %v494_v18 = vld [vmem:[%s663_s6 + $0x8] sm:$0xff]   ;;  %v497_v29 = vld [vmem:[%s664_s8 + $0x10] sm:$0xff]   ;;  %v365_v50 = vand.u32 127, %v364_v49 }
   0x4   :  { %446 = vmatprep.subr.bf16.mxu1 %v505_v0  ;;  %v408_v9 = vld [vmem:[%s662_s3] ss:$0 sm:$0xff]  ;;  %v496_v28 = vld [vmem:[%s664_s8 + $0x8] sm:$0xff]   ;;  %v498_v30 = vld [vmem:[%s664_s8 + $0x18] sm:$0xff]  }
   0x5   :  { %v493_v17 = vld [vmem:[%s663_s6] sm:$0xff]  }
   0x6   :  { %465 = vmatpush3.bf16.msra.mxu0 %v493_v17  ;;  %v412_v19 = vld [vmem:[%s665_s5] ss:$0 sm:$0xff] }
   0x7   :  { %447 = vmatpush3.bf16.msra.mxu1 %v488_v2  ;;  %466 = vmatprep.subr.bf16.mxu0 %v505_v0  ;;  %v495_v26 = vld [vmem:[%s664_s8] sm:$0xff]  }
   0x8   :  { %452 = vmatprep.subr.bf16.mxu1 %v505_v0  ;;  %v418_v31 = vld [vmem:[%s666_s7] ss:$0 sm:$0xff] }
   0x9   :  { %v422_v39 = vld [vmem:[%s667_s9] ss:$0 sm:$0xff] }
   0xa   :  { %449 = vmatmul.mubr.msk.bf16.vlgmr.msra.gmra.mrb[0].mxu1 %vm61_vm1, %v42_v4  ;;  %467 = vmatpush3.bf16.msra.mxu0 %v494_v18  ;;  %v362_v41 = vld [vmem:[%s668_s1] sm:$0xff]  ;;  %s507_s1 = smov 127  }
   0xb   :  { %453 = vmatpush3.bf16.msra.mxu1 %v489_v5  ;;  %460 = vmatprep.mubr.msk.bf16.mxu1 %vm506_vm0, %v505_v0 }
   0xc   :  { %454 = vmatprep.subr.bf16.mxu1 %v505_v0  ;;  %472 = vmatprep.subr.bf16.mxu0 %v505_v0 }
   0xf   :  { %455 = vmatpush3.bf16.msra.mxu1 %v490_v6 }
  0x10   :  { %456 = vmatprep.subr.bf16.mxu1 %v505_v0 }
  0x13   :  { %457 = vmatpush3.bf16.msra.mxu1 %v491_v7 }
  0x14   :  { %458 = vmatprep.subr.bf16.mxu1 %v505_v0 }
  0x17   :  { %459 = vmatpush3.bf16.msra.mxu1 %v492_v8 }
  0xdd   :  { %v99_v10 = vpop.f32.mrb[0].mxu1 }
  0xde   :  { %v100_v11 = vadd.f32 %v408_v9, %v99_v10  ;;  %v450_v12 = vpop.f32.mrb[1].mxu1 }
  0xdf   :  { %v102_v13 = vpop.f32.mrb[2].mxu1 }
  0xe0   :  { %v105_v14 = vmax.f32 %v100_v11, 0.0  ;;  %v451_v15 = vpop.f32.mrb[3].mxu1 }
  0xe2   :  { %v115_v16 = vpack.c.bf16 %v105_v14, %v105_v14 }
  0xe4   :  { %461 = vmatmul.mubr.msk.bf16.vlgmr.msra.gmra.mrb[4].mxu1 %vm146_vm2, %v115_v16 }
 0x1b7   :  { %v184_v20 = vpop.f32.mrb[4].mxu1 }
 0x1b8   :  { %v185_v21 = vadd.f32 %v412_v19, %v184_v20  ;;  %v462_v22 = vpop.f32.mrb[5].mxu1 }
 0x1b9   :  { %v187_v23 = vpop.f32.mrb[6].mxu1 }
 0x1ba   :  { %v190_v24 = vmax.f32 %v185_v21, 0.0  ;;  %v463_v25 = vpop.f32.mrb[7].mxu1 }
 0x1bc   :  { %v196_v27 = vpack.c.bf16 %v190_v24, %v190_v24 }
 0x1be   :  { %469 = vmatmul.mubr.msk.bf16.vlgmr.msra.gmra.mrb[0].mxu0 %vm61_vm1, %v196_v27 }
 0x1bf   :  { %473 = vmatpush3.bf16.msra.mxu0 %v495_v26  ;;  %480 = vmatprep.mubr.msk.bf16.mxu0 %vm506_vm0, %v505_v0 }
 0x1c0   :  { %474 = vmatprep.subr.bf16.mxu0 %v505_v0 }
 0x1c3   :  { %475 = vmatpush3.bf16.msra.mxu0 %v496_v28 }
 0x1c4   :  { %476 = vmatprep.subr.bf16.mxu0 %v505_v0 }
 0x1c7   :  { %477 = vmatpush3.bf16.msra.mxu0 %v497_v29 }
 0x1c8   :  { %478 = vmatprep.subr.bf16.mxu0 %v505_v0 }
 0x1cb   :  { %479 = vmatpush3.bf16.msra.mxu0 %v498_v30 }
 0x291   :  { %v252_v32 = vpop.f32.mrb[0].mxu0 }
 0x292   :  { %v253_v33 = vadd.f32 %v418_v31, %v252_v32  ;;  %v470_v34 = vpop.f32.mrb[1].mxu0 }
 0x293   :  { %v255_v35 = vpop.f32.mrb[2].mxu0 }
 0x294   :  { %v258_v36 = vmax.f32 %v253_v33, 0.0  ;;  %v471_v37 = vpop.f32.mrb[3].mxu0 }
 0x296   :  { %v268_v38 = vpack.c.bf16 %v258_v36, %v258_v36 }
 0x298   :  { %481 = vmatmul.mubr.msk.bf16.vlgmr.msra.gmra.mrb[4].mxu0 %vm146_vm2, %v268_v38 }
 0x36b   :  { %v336_v40 = vpop.f32.mrb[4].mxu0 }
 0x36c   :  { %v337_v42 = vadd.f32 %v422_v39, %v336_v40  ;;  %v482_v43 = vpop.f32.mrb[5].mxu0 }
 0x36d   :  { %v339_v44 = vpop.f32.mrb[6].mxu0 }
 0x36e   :  { %v483_v45 = vpop.f32.mrb[7].mxu0  ;;  %v363_v46 = vadd.f32 %v362_v41, %v337_v42  ;;  %v343_v48 = vsel %vm342_vm3, %v337_v42, -inf }
 0x370   :  { %v366_v47 = vsel %vm342_vm3, %v363_v46, -inf }
 0x371   :  { %367 = vmax.xlane.f32.xlu0 %v366_v47 }
 0x375   :  { %344 = vmax.xlane.f32.xlu0 %v343_v48 }
 0x3fe   :  { %v368_v51 = vpop.xlane.xlu0 %367 }
 0x3ff   :  { %vm369_vm4 = vcmp.ge.f32.partialorder %v363_v46, %v368_v51 }
 0x400   :  { %v370_v52 = vsel %vm369_vm4, %v365_v50, 4 }
 0x401   :  { %v371_v53 = vsel %vm342_vm3, %v370_v52, 2147483647 }
 0x402   :  { %v345_v54 = vpop.xlane.xlu0 %344  ;;  %v373_v55 = vshra.s32 %v371_v53, 16  ;;  %v372_v61 = vand.u32 65535, %v371_v53 }
 0x403   :  { %v346_v56 = vsub.f32 %v337_v42, %v345_v54 }
 0x404   :  { %v375_v57 = vcvt.s32.f32 %v373_v55  ;;  %v374_v63 = vcvt.s32.f32 %v372_v61 }
 0x405   :  { %v347_v58 = vmul.f32 1.442695, %v346_v56 }
 0x406   :  { %376 = vmin.xlane.f32.xlu1 %v375_v57 }
 0x407   :  { %499 = vpow2.f32 %v347_v58 }
 0x411   :  { %v500_v59 = vpop.eup %499 }
 0x412   :  { %v349_v60 = vsel %vm342_vm3, %v500_v59, 0.0 }
 0x413   :  { %350 = vadd.xlane.f32.xlu1 %v349_v60 }
 0x493   :  { %v377_v62 = vpop.xlane.xlu1 %376 }
 0x494   :  { %vm378_vm5 = vcmp.eq.f32.partialorder %v375_v57, %v377_v62  ;;  %v383_v9 = vcvt.f32.s32 %v377_v62 }
 0x495   :  { %v379_v0 = vsel %vm378_vm5, %v374_v63, inf }
 0x496   :  { %380 = vmin.xlane.f32.xlu0 %v379_v0  ;;  %v384_v11 = vshll.u32 %v383_v9, 16 }
 0x4a0   :  { %v351_v1 = vpop.xlane.xlu1 %350 }
 0x4a1   :  { %501 = vlog2.f32 %v351_v1 }
 0x4a2   :  { %503 = vrcp.f32 %v351_v1 }
 0x4ab   :  { %v502_v2 = vpop.eup %501 }
 0x4ac   :  { %v504_v3 = vpop.eup %503  ;;  %v353_v4 = vmul.f32 0.6931472, %v502_v2 }
 0x4ad   :  { %v356_v6 = vmul.f32 %v504_v3, %v500_v59 }
 0x4ae   :  { %v354_v5 = vsub.f32 %v346_v56, %v353_v4 }
 0x4b0   :  { %v357_v7 = vmul.f32 %v356_v6, %v354_v5 }
 0x4b2   :  { %v358_v8 = vsel %vm342_vm3, %v357_v7, 0.0 }
 0x4b3   :  { %359 = vadd.xlane.f32.xlu1 %v358_v8 }
 0x4c4   :  { %399 = vrot.lane.b32.xlu1 %v337_v42, %s507_s1 }
 0x523   :  { %v381_v10 = vpop.xlane.xlu0 %380 }
 0x524   :  { %v382_v12 = vcvt.f32.s32 %v381_v10 }
 0x526   :  { %v385_v13 = vadd.s32 %v384_v11, %v382_v12 }
 0x528   :  { %v391_v14 = vcvt.s32.f32 %v385_v13  ;;  %vm386_vm7 = vcmp.eq.s32.totalorder %v365_v50, %v385_v13 }
 0x529   :  { %v387_v15 = vsel %vm386_vm7, %v354_v5, 0.0 }
 0x52a   :  { %v388_v16 = vsel %vm342_vm3, %v387_v15, 0.0  ;;  %393 = vst.msk [vmem:[%s669_s10] sm:$0xff] %vm392_vm6, %v391_v14 }
 0x52b   :  { %389 = vadd.xlane.f32.xlu0 %v388_v16 }
 0x540   :  { %v360_v17 = vpop.xlane.xlu1 %359 }
 0x541   :  { %v361_v18 = vsub.f32 0.0, %v360_v17 }
 0x544   :  { %v400_v20 = vpop.permute.xlu1 %399 }
 0x5b8   :  { %v390_v19 = vpop.xlane.xlu0 %389 }
 0x5b9   :  { %395 = vst.msk [vmem:[%s669_s10] sm:$0xff] %vm394_vm8, %v390_v19 }
 0x5ba   :  { %397 = vst.msk [vmem:[%s669_s10] sm:$0xff] %vm396_vm9, %v361_v18 }
 0x5bb   :  { %403 = vst.msk [vmem:[%s669_s10] sm:$0xff] %vm402_vm10, %v400_v20 }

</bundles_post_ra>
